<compile_context>
chip_gen: v5e
topology: v5e:2x2
jax: 0.10.0
libtpu: 0.0.40
codegen_flags: <defaults>
</compile_context>

<pallas_src>
import functools

import jax
import jax.numpy as jnp
from jax.experimental import pallas as pl
from jax.experimental.pallas import tpu as pltpu


def _fused_cnn_pool_head_kernel(x_ref, wc_ref, bc_ref, g_ref, bt_ref,
                                wl_ref, bl_ref, o_ref, patches_ref,
                                *, H, W, Cin):
    HW = H * W
    x = x_ref[0]                                            # (Cin, H*W) lane-dense

    # Column index (w coordinate) of each flattened pixel; masks the horizontal
    # wrap-around introduced by flat-index shifts.
    col = jax.lax.broadcasted_iota(jnp.int32, (Cin, HW), 1) % W
    x_mid = x
    x_for_left = jnp.where(col < W - 1, x, 0.0)    # taps reading column w-1
    x_for_right = jnp.where(col > 0, x, 0.0)       # taps reading column w+1

    # Build the (9*Cin, H*W) im2col patch matrix in VMEM.  Row (dh*3+dw)*Cin + c
    # is channel c shifted by (dh-1, dw-1), zero outside the image: unwritten
    # lane margins stay zero (vertical halo), column masks handle the horizontal
    # halo.  Zeroed every step so it is safe per-core under megacore sharding.
    patches_ref[...] = jnp.zeros_like(patches_ref)
    for dh in range(3):
        for dw in range(3):
            t = dh * 3 + dw
            s = (dh - 1) * W + (dw - 1)             # flat source shift
            src = (x_for_left, x_mid, x_for_right)[dw]
            length = HW - abs(s)
            d0 = max(0, -s)                         # first destination lane
            s0 = max(0, s)                          # first source lane
            patches_ref[pl.ds(t * Cin, Cin), pl.ds(d0, length)] = (
                src[:, s0:s0 + length])

    # One MXU matmul for all 9 taps: (Cout, 9*Cin) @ (9*Cin, H*W) -> (Cout, H*W).
    conv = jnp.dot(wc_ref[...], patches_ref[...],
                   preferred_element_type=jnp.float32)
    feat = jnp.maximum(conv + bc_ref[...], 0.0)             # bias + ReLU, lane-dense

    # Global mean pool over all pixels (lane reduction) -- fused, so the feature
    # map never leaves VMEM.
    pooled = jnp.sum(feat, axis=-1, keepdims=True) * (1.0 / HW)    # (Cout, 1)

    # LayerNorm over channels (biased variance, eps=1e-6 inside rsqrt == PyTorch).
    mu = jnp.mean(pooled, axis=0, keepdims=True)
    d = pooled - mu
    var = jnp.mean(d * d, axis=0, keepdims=True)
    normed = d * jax.lax.rsqrt(var + 1e-6)
    normed = normed * g_ref[...] + bt_ref[...]              # (Cout, 1)

    # Linear: weights kept in PyTorch (Dout, Cin) orientation -> column product.
    logits = jnp.dot(wl_ref[...], normed,
                     preferred_element_type=jnp.float32) + bl_ref[...]   # (Dout, 1)

    # Softmax over the output dim (EUP exp + approx reciprocal).
    m = jnp.max(logits, axis=0, keepdims=True)
    e = jnp.exp(logits - m)
    denom = jnp.sum(e, axis=0, keepdims=True)
    o_ref[0] = (e * pl.reciprocal(denom, approx=True)).astype(o_ref.dtype)


def cnn_pool_head_forward(x_nchw, params):
    B, Cin, H, W = x_nchw.shape
    conv_w = params["conv_w"]                  # (3, 3, Cin, Cout) HWIO
    Cout = conv_w.shape[-1]
    lin_w = params["lin_w"]                    # (Dout, Cout), PyTorch (out, in)
    Dout = lin_w.shape[0]
    HW = H * W

    # Free metadata reshape: NCHW is channel-major, so pixels land on the lane
    # axis with no transpose, no pad, no extra HBM round trip.
    x_flat = x_nchw.reshape(B, Cin, HW)
    wc = conv_w.reshape(9 * Cin, Cout).T       # (Cout, 9*Cin), tap order (dh,dw,c)
    bc = params["conv_b"].reshape(Cout, 1)
    g = params["ln_gamma"].reshape(Cout, 1)
    bt = params["ln_beta"].reshape(Cout, 1)
    bl = params["lin_b"].reshape(Dout, 1)

    kernel = functools.partial(_fused_cnn_pool_head_kernel, H=H, W=W, Cin=Cin)
    out = pl.pallas_call(
        kernel,
        out_shape=jax.ShapeDtypeStruct((B, Dout, 1), jnp.float32),
        grid_spec=pltpu.PrefetchScalarGridSpec(
            num_scalar_prefetch=0,
            grid=(B,),                         # one image per step
            in_specs=[
                pl.BlockSpec((1, Cin, HW), lambda b: (b, 0, 0)),
                pl.BlockSpec((Cout, 9 * Cin), lambda b: (0, 0)),
                pl.BlockSpec((Cout, 1), lambda b: (0, 0)),
                pl.BlockSpec((Cout, 1), lambda b: (0, 0)),
                pl.BlockSpec((Cout, 1), lambda b: (0, 0)),
                pl.BlockSpec((Dout, Cout), lambda b: (0, 0)),
                pl.BlockSpec((Dout, 1), lambda b: (0, 0)),
            ],
            out_specs=pl.BlockSpec((1, Dout, 1), lambda b: (b, 0, 0)),
            scratch_shapes=[pltpu.VMEM((9 * Cin, HW), jnp.float32)],
        ),
        compiler_params=pltpu.CompilerParams(
            dimension_semantics=("parallel",)),   # shards batch across v7x's 2 TCs
    )(x_flat, wc, bc, g, bt, lin_w, bl)
    return out[:, :, 0]


def _reference_forward(x_nchw, params):
    # pure-JAX reference for sanity checking
    x = jnp.transpose(x_nchw, (0, 2, 3, 1))
    feat = jax.lax.conv_general_dilated(
        x, params["conv_w"], window_strides=(1, 1), padding="SAME",
        dimension_numbers=("NHWC", "HWIO", "NHWC"))
    feat = jnp.maximum(feat + params["conv_b"][None, None, None, :], 0.0)
    pooled = jnp.mean(feat, axis=(1, 2))
    mu = jnp.mean(pooled, axis=-1, keepdims=True)
    var = jnp.mean((pooled - mu) ** 2, axis=-1, keepdims=True)
    normed = (pooled - mu) / jnp.sqrt(var + 1e-6)
    normed = normed * params["ln_gamma"] + params["ln_beta"]
    logits = normed @ params["lin_w"].T + params["lin_b"]
    return jax.nn.softmax(logits, axis=-1)


if __name__ == "__main__":
    B, Cin, H, W = 2, 4, 16, 16      # PyTorch NCHW input shape
    Cout = 8                         # trunk output channels == head input_dim
    Dout = 16                        # head output_dim

    key = jax.random.PRNGKey(0)
    k_x, k_cw, k_cb, k_lw, k_lb = jax.random.split(key, 5)

    x = jax.random.normal(k_x, (B, Cin, H, W), jnp.float32)
    params = {
        "conv_w": jax.random.normal(k_cw, (3, 3, Cin, Cout), jnp.float32) * 0.1,
        "conv_b": jax.random.normal(k_cb, (Cout,), jnp.float32) * 0.1,
        "ln_gamma": jnp.ones((Cout,), jnp.float32),
        "ln_beta": jnp.zeros((Cout,), jnp.float32),
        "lin_w": jax.random.normal(k_lw, (Dout, Cout), jnp.float32) * 0.1,
        "lin_b": jax.random.normal(k_lb, (Dout,), jnp.float32) * 0.1,
    }

    out = jax.block_until_ready(cnn_pool_head_forward(x, params))
    ref = jax.block_until_ready(_reference_forward(x, params))
    assert out.shape == (B, Dout)
    # approx reciprocal in the softmax denominator -> slightly looser tolerance
    assert jnp.allclose(out, ref, atol=2e-3, rtol=2e-3), "mismatch vs reference"

    print("KERNEL_OK")
</pallas_src>

<mosaic_0001>
module attributes {stable_mosaic.version = 11 : i64} {
  func.func @_fused_cnn_pool_head_kernel(%arg0: i32, %arg1: memref<1x4x256xf32, #tpu.memory_space<vmem>>, %arg2: memref<8x36xf32, #tpu.memory_space<vmem>>, %arg3: memref<8x1xf32, #tpu.memory_space<vmem>>, %arg4: memref<8x1xf32, #tpu.memory_space<vmem>>, %arg5: memref<8x1xf32, #tpu.memory_space<vmem>>, %arg6: memref<16x8xf32, #tpu.memory_space<vmem>>, %arg7: memref<16x1xf32, #tpu.memory_space<vmem>>, %arg8: memref<1x16x1xf32, #tpu.memory_space<vmem>>, %arg9: memref<36x256xf32, #tpu.memory_space<vmem>>) attributes {dimension_semantics = [#tpu.dimension_semantics<parallel>], iteration_bounds = array<i64: 2>, scalar_prefetch = 0 : i64, scratch_operands = 1 : i64, tpu.core_type = #tpu.core_type<tc>, window_params = [{transform_indices = @transform_0, window_bounds = array<i64: 1, 4, 256>}, {pipeline_mode = #tpu.pipeline_mode<synchronous>, transform_indices = @transform_1, window_bounds = array<i64: 8, 36>}, {pipeline_mode = #tpu.pipeline_mode<synchronous>, transform_indices = @transform_2, window_bounds = array<i64: 8, 1>}, {pipeline_mode = #tpu.pipeline_mode<synchronous>, transform_indices = @transform_3, window_bounds = array<i64: 8, 1>}, {pipeline_mode = #tpu.pipeline_mode<synchronous>, transform_indices = @transform_4, window_bounds = array<i64: 8, 1>}, {pipeline_mode = #tpu.pipeline_mode<synchronous>, transform_indices = @transform_5, window_bounds = array<i64: 16, 8>}, {pipeline_mode = #tpu.pipeline_mode<synchronous>, transform_indices = @transform_6, window_bounds = array<i64: 16, 1>}, {transform_indices = @transform_7, window_bounds = array<i64: 1, 16, 1>}]} {
    %c0 = arith.constant 0 : index
    %c0_0 = arith.constant 0 : index
    %c0_1 = arith.constant 0 : index
    %0 = vector.load %arg1[%c0, %c0_0, %c0_1] : memref<1x4x256xf32, #tpu.memory_space<vmem>>, vector<1x4x256xf32>
    %1 = vector.shape_cast %0 : vector<1x4x256xf32> to vector<4x256xf32>
    %2 = tpu.iota {dimensions = array<i32: 1>} : vector<4x256xi32>
    %c16_i32 = arith.constant 16 : i32
    %c0_i32 = arith.constant 0 : i32
    %3 = arith.cmpi eq, %c16_i32, %c0_i32 : i32
    %c1_i32 = arith.constant 1 : i32
    %4 = arith.select %3, %c1_i32, %c16_i32 : i32
    %5 = vector.broadcast %4 : i32 to vector<4x256xi32>
    %6 = arith.remsi %2, %5 : vector<4x256xi32>
    %c0_i32_2 = arith.constant 0 : i32
    %7 = vector.broadcast %c0_i32_2 : i32 to vector<4x256xi32>
    %8 = arith.cmpi ne, %6, %7 : vector<4x256xi32>
    %c0_i32_3 = arith.constant 0 : i32
    %9 = vector.broadcast %c0_i32_3 : i32 to vector<4x256xi32>
    %10 = arith.cmpi slt, %6, %9 : vector<4x256xi32>
    %c0_i32_4 = arith.constant 0 : i32
    %11 = arith.cmpi slt, %4, %c0_i32_4 : i32
    %12 = vector.broadcast %11 : i1 to vector<4x256xi1>
    %13 = vector.broadcast %12 : vector<4x256xi1> to vector<4x256xi1>
    %14 = arith.xori %10, %13 : vector<4x256xi1>
    %15 = arith.andi %14, %8 : vector<4x256xi1>
    %16 = vector.broadcast %4 : i32 to vector<4x256xi32>
    %17 = arith.addi %6, %16 : vector<4x256xi32>
    %18 = arith.select %15, %17, %6 : vector<4x256xi1>, vector<4x256xi32>
    %c15_i32 = arith.constant 15 : i32
    %19 = vector.broadcast %c15_i32 : i32 to vector<4x256xi32>
    %20 = arith.cmpi slt, %18, %19 : vector<4x256xi32>
    %cst = arith.constant 0.000000e+00 : f32
    %21 = vector.broadcast %cst : f32 to vector<4x256xf32>
    %22 = arith.select %20, %1, %21 : vector<4x256xi1>, vector<4x256xf32>
    %c0_i32_5 = arith.constant 0 : i32
    %23 = vector.broadcast %c0_i32_5 : i32 to vector<4x256xi32>
    %24 = arith.cmpi sgt, %18, %23 : vector<4x256xi32>
    %cst_6 = arith.constant 0.000000e+00 : f32
    %25 = vector.broadcast %cst_6 : f32 to vector<4x256xf32>
    %26 = arith.select %24, %1, %25 : vector<4x256xi1>, vector<4x256xf32>
    %cst_7 = arith.constant 0.000000e+00 : f32
    %27 = vector.broadcast %cst_7 : f32 to vector<36x256xf32>
    %c0_8 = arith.constant 0 : index
    %c0_9 = arith.constant 0 : index
    %28 = vector.load %arg9[%c0_8, %c0_9] : memref<36x256xf32, #tpu.memory_space<vmem>>, vector<36x256xf32>
    tpu.vector_store %arg9[%c0_8, %c0_9], %27 {strides = array<i32>} : memref<36x256xf32, #tpu.memory_space<vmem>>, vector<36x256xf32>,
    %29 = vector.extract_strided_slice %22 {offsets = [0, 0], sizes = [4, 239], strides = [1, 1]} : vector<4x256xf32> to vector<4x239xf32>
    %c0_10 = arith.constant 0 : index
    %c17 = arith.constant 17 : index
    %30 = vector.load %arg9[%c0_10, %c17] : memref<36x256xf32, #tpu.memory_space<vmem>>, vector<4x239xf32>
    tpu.vector_store %arg9[%c0_10, %c17], %29 {strides = array<i32>} : memref<36x256xf32, #tpu.memory_space<vmem>>, vector<4x239xf32>,
    %31 = vector.extract_strided_slice %1 {offsets = [0, 0], sizes = [4, 240], strides = [1, 1]} : vector<4x256xf32> to vector<4x240xf32>
    %c4 = arith.constant 4 : index
    %c16 = arith.constant 16 : index
    %32 = vector.load %arg9[%c4, %c16] : memref<36x256xf32, #tpu.memory_space<vmem>>, vector<4x240xf32>
    tpu.vector_store %arg9[%c4, %c16], %31 {strides = array<i32>} : memref<36x256xf32, #tpu.memory_space<vmem>>, vector<4x240xf32>,
    %33 = vector.extract_strided_slice %26 {offsets = [0, 0], sizes = [4, 241], strides = [1, 1]} : vector<4x256xf32> to vector<4x241xf32>
    %c8 = arith.constant 8 : index
    %c15 = arith.constant 15 : index
    %34 = vector.load %arg9[%c8, %c15] : memref<36x256xf32, #tpu.memory_space<vmem>>, vector<4x241xf32>
    tpu.vector_store %arg9[%c8, %c15], %33 {strides = array<i32>} : memref<36x256xf32, #tpu.memory_space<vmem>>, vector<4x241xf32>,
    %35 = vector.extract_strided_slice %22 {offsets = [0, 0], sizes = [4, 255], strides = [1, 1]} : vector<4x256xf32> to vector<4x255xf32>
    %c12 = arith.constant 12 : index
    %c1 = arith.constant 1 : index
    %36 = vector.load %arg9[%c12, %c1] : memref<36x256xf32, #tpu.memory_space<vmem>>, vector<4x255xf32>
    tpu.vector_store %arg9[%c12, %c1], %35 {strides = array<i32>} : memref<36x256xf32, #tpu.memory_space<vmem>>, vector<4x255xf32>,
    %c16_11 = arith.constant 16 : index
    %c0_12 = arith.constant 0 : index
    %37 = vector.load %arg9[%c16_11, %c0_12] : memref<36x256xf32, #tpu.memory_space<vmem>>, vector<4x256xf32>
    tpu.vector_store %arg9[%c16_11, %c0_12], %1 {strides = array<i32>} : memref<36x256xf32, #tpu.memory_space<vmem>>, vector<4x256xf32>,
    %38 = vector.extract_strided_slice %26 {offsets = [0, 1], sizes = [4, 255], strides = [1, 1]} : vector<4x256xf32> to vector<4x255xf32>
    %c20 = arith.constant 20 : index
    %c0_13 = arith.constant 0 : index
    %39 = vector.load %arg9[%c20, %c0_13] : memref<36x256xf32, #tpu.memory_space<vmem>>, vector<4x255xf32>
    tpu.vector_store %arg9[%c20, %c0_13], %38 {strides = array<i32>} : memref<36x256xf32, #tpu.memory_space<vmem>>, vector<4x255xf32>,
    %40 = vector.extract_strided_slice %22 {offsets = [0, 15], sizes = [4, 241], strides = [1, 1]} : vector<4x256xf32> to vector<4x241xf32>
    %c24 = arith.constant 24 : index
    %c0_14 = arith.constant 0 : index
    %41 = vector.load %arg9[%c24, %c0_14] : memref<36x256xf32, #tpu.memory_space<vmem>>, vector<4x241xf32>
    tpu.vector_store %arg9[%c24, %c0_14], %40 {strides = array<i32>} : memref<36x256xf32, #tpu.memory_space<vmem>>, vector<4x241xf32>,
    %42 = vector.extract_strided_slice %1 {offsets = [0, 16], sizes = [4, 240], strides = [1, 1]} : vector<4x256xf32> to vector<4x240xf32>
    %c28 = arith.constant 28 : index
    %c0_15 = arith.constant 0 : index
    %43 = vector.load %arg9[%c28, %c0_15] : memref<36x256xf32, #tpu.memory_space<vmem>>, vector<4x240xf32>
    tpu.vector_store %arg9[%c28, %c0_15], %42 {strides = array<i32>} : memref<36x256xf32, #tpu.memory_space<vmem>>, vector<4x240xf32>,
    %44 = vector.extract_strided_slice %26 {offsets = [0, 17], sizes = [4, 239], strides = [1, 1]} : vector<4x256xf32> to vector<4x239xf32>
    %c32 = arith.constant 32 : index
    %c0_16 = arith.constant 0 : index
    %45 = vector.load %arg9[%c32, %c0_16] : memref<36x256xf32, #tpu.memory_space<vmem>>, vector<4x239xf32>
    tpu.vector_store %arg9[%c32, %c0_16], %44 {strides = array<i32>} : memref<36x256xf32, #tpu.memory_space<vmem>>, vector<4x239xf32>,
    %c0_17 = arith.constant 0 : index
    %c0_18 = arith.constant 0 : index
    %46 = vector.load %arg2[%c0_17, %c0_18] : memref<8x36xf32, #tpu.memory_space<vmem>>, vector<8x36xf32>
    %c0_19 = arith.constant 0 : index
    %c0_20 = arith.constant 0 : index
    %47 = vector.load %arg9[%c0_19, %c0_20] : memref<36x256xf32, #tpu.memory_space<vmem>>, vector<36x256xf32>
    %cst_21 = arith.constant dense<0.000000e+00> : vector<8x256xf32>
    %48 = tpu.matmul %46, %47, %cst_21 {dimension_numbers = #tpu.dot_dimension_numbers<[1], [0], [0], [1], [0, 0, 1, 1], [], []>} : vector<8x36xf32>, vector<36x256xf32>, vector<8x256xf32> -> vector<8x256xf32>
    %c0_22 = arith.constant 0 : index
    %c0_23 = arith.constant 0 : index
    %49 = vector.load %arg3[%c0_22, %c0_23] : memref<8x1xf32, #tpu.memory_space<vmem>>, vector<8x1xf32>
    %50 = vector.broadcast %49 : vector<8x1xf32> to vector<8x256xf32>
    %51 = arith.addf %48, %50 : vector<8x256xf32>
    %cst_24 = arith.constant 0.000000e+00 : f32
    %52 = vector.broadcast %cst_24 : f32 to vector<8x256xf32>
    %53 = arith.maximumf %51, %52 : vector<8x256xf32>
    %cst_25 = arith.constant dense<0.000000e+00> : vector<8xf32>
    %54 = vector.multi_reduction <add>, %53, %cst_25 [1] : vector<8x256xf32> to vector<8xf32>
    %55 = vector.shape_cast %54 : vector<8xf32> to vector<8x1xf32>
    %cst_26 = arith.constant 3.906250e-03 : f32
    %56 = vector.broadcast %cst_26 : f32 to vector<8x1xf32>
    %57 = arith.mulf %55, %56 : vector<8x1xf32>
    %cst_27 = arith.constant dense<0.000000e+00> : vector<1xf32>
    %58 = vector.multi_reduction <add>, %57, %cst_27 [0] : vector<8x1xf32> to vector<1xf32>
    %59 = vector.shape_cast %58 : vector<1xf32> to vector<1x1xf32>
    %cst_28 = arith.constant 8.000000e+00 : f32
    %60 = vector.broadcast %cst_28 : f32 to vector<1x1xf32>
    %61 = arith.divf %59, %60 : vector<1x1xf32>
    %62 = vector.broadcast %61 : vector<1x1xf32> to vector<8x1xf32>
    %63 = arith.subf %57, %62 : vector<8x1xf32>
    %64 = arith.mulf %63, %63 : vector<8x1xf32>
    %cst_29 = arith.constant dense<0.000000e+00> : vector<1xf32>
    %65 = vector.multi_reduction <add>, %64, %cst_29 [0] : vector<8x1xf32> to vector<1xf32>
    %66 = vector.shape_cast %65 : vector<1xf32> to vector<1x1xf32>
    %cst_30 = arith.constant 8.000000e+00 : f32
    %67 = vector.broadcast %cst_30 : f32 to vector<1x1xf32>
    %68 = arith.divf %66, %67 : vector<1x1xf32>
    %cst_31 = arith.constant 9.99999997E-7 : f32
    %69 = vector.broadcast %cst_31 : f32 to vector<1x1xf32>
    %70 = arith.addf %68, %69 : vector<1x1xf32>
    %71 = math.rsqrt %70 : vector<1x1xf32>
    %72 = vector.broadcast %71 : vector<1x1xf32> to vector<8x1xf32>
    %73 = arith.mulf %63, %72 : vector<8x1xf32>
    %c0_32 = arith.constant 0 : index
    %c0_33 = arith.constant 0 : index
    %74 = vector.load %arg4[%c0_32, %c0_33] : memref<8x1xf32, #tpu.memory_space<vmem>>, vector<8x1xf32>
    %75 = arith.mulf %73, %74 : vector<8x1xf32>
    %c0_34 = arith.constant 0 : index
    %c0_35 = arith.constant 0 : index
    %76 = vector.load %arg5[%c0_34, %c0_35] : memref<8x1xf32, #tpu.memory_space<vmem>>, vector<8x1xf32>
    %77 = arith.addf %75, %76 : vector<8x1xf32>
    %c0_36 = arith.constant 0 : index
    %c0_37 = arith.constant 0 : index
    %78 = vector.load %arg6[%c0_36, %c0_37] : memref<16x8xf32, #tpu.memory_space<vmem>>, vector<16x8xf32>
    %cst_38 = arith.constant dense<0.000000e+00> : vector<16x1xf32>
    %79 = tpu.matmul %78, %77, %cst_38 {dimension_numbers = #tpu.dot_dimension_numbers<[1], [0], [0], [1], [0, 0, 1, 1], [], []>} : vector<16x8xf32>, vector<8x1xf32>, vector<16x1xf32> -> vector<16x1xf32>
    %c0_39 = arith.constant 0 : index
    %c0_40 = arith.constant 0 : index
    %80 = vector.load %arg7[%c0_39, %c0_40] : memref<16x1xf32, #tpu.memory_space<vmem>>, vector<16x1xf32>
    %81 = arith.addf %79, %80 : vector<16x1xf32>
    %cst_41 = arith.constant dense<0xFF800000> : vector<1xf32>
    %82 = vector.multi_reduction <maximumf>, %81, %cst_41 [0] : vector<16x1xf32> to vector<1xf32>
    %83 = vector.shape_cast %82 : vector<1xf32> to vector<1x1xf32>
    %84 = vector.broadcast %83 : vector<1x1xf32> to vector<16x1xf32>
    %85 = arith.subf %81, %84 : vector<16x1xf32>
    %86 = math.exp %85 : vector<16x1xf32>
    %cst_42 = arith.constant dense<0.000000e+00> : vector<1xf32>
    %87 = vector.multi_reduction <add>, %86, %cst_42 [0] : vector<16x1xf32> to vector<1xf32>
    %88 = vector.shape_cast %87 : vector<1xf32> to vector<1x1xf32>
    %89 = tpu.reciprocal %88 {approx = true} : vector<1x1xf32> -> vector<1x1xf32>
    %90 = vector.broadcast %89 : vector<1x1xf32> to vector<16x1xf32>
    %91 = arith.mulf %86, %90 : vector<16x1xf32>
    %c0_43 = arith.constant 0 : index
    %c0_44 = arith.constant 0 : index
    %c0_45 = arith.constant 0 : index
    %92 = vector.load %arg8[%c0_43, %c0_44, %c0_45] : memref<1x16x1xf32, #tpu.memory_space<vmem>>, vector<1x16x1xf32>
    %93 = vector.shape_cast %92 : vector<1x16x1xf32> to vector<16x1xf32>
    %94 = vector.shape_cast %91 : vector<16x1xf32> to vector<1x16x1xf32>
    tpu.vector_store %arg8[%c0_43, %c0_44, %c0_45], %94 {strides = array<i32>} : memref<1x16x1xf32, #tpu.memory_space<vmem>>, vector<1x16x1xf32>,
    return
  }
  func.func @transform_0(%arg0: i32) -> (i32, i32, i32) {
    %c0_i32 = arith.constant 0 : i32
    %c0_i32_0 = arith.constant 0 : i32
    %c0_i32_1 = arith.constant 0 : i32
    return %arg0, %c0_i32, %c0_i32_0 : i32, i32, i32
  }
  func.func @transform_1(%arg0: i32) -> (i32, i32) {
    %c0_i32 = arith.constant 0 : i32
    %c0_i32_0 = arith.constant 0 : i32
    %c0_i32_1 = arith.constant 0 : i32
    return %c0_i32, %c0_i32_0 : i32, i32
  }
  func.func @transform_2(%arg0: i32) -> (i32, i32) {
    %c0_i32 = arith.constant 0 : i32
    %c0_i32_0 = arith.constant 0 : i32
    %c0_i32_1 = arith.constant 0 : i32
    return %c0_i32, %c0_i32_0 : i32, i32
  }
  func.func @transform_3(%arg0: i32) -> (i32, i32) {
    %c0_i32 = arith.constant 0 : i32
    %c0_i32_0 = arith.constant 0 : i32
    %c0_i32_1 = arith.constant 0 : i32
    return %c0_i32, %c0_i32_0 : i32, i32
  }
  func.func @transform_4(%arg0: i32) -> (i32, i32) {
    %c0_i32 = arith.constant 0 : i32
    %c0_i32_0 = arith.constant 0 : i32
    %c0_i32_1 = arith.constant 0 : i32
    return %c0_i32, %c0_i32_0 : i32, i32
  }
  func.func @transform_5(%arg0: i32) -> (i32, i32) {
    %c0_i32 = arith.constant 0 : i32
    %c0_i32_0 = arith.constant 0 : i32
    %c0_i32_1 = arith.constant 0 : i32
    return %c0_i32, %c0_i32_0 : i32, i32
  }
  func.func @transform_6(%arg0: i32) -> (i32, i32) {
    %c0_i32 = arith.constant 0 : i32
    %c0_i32_0 = arith.constant 0 : i32
    %c0_i32_1 = arith.constant 0 : i32
    return %c0_i32, %c0_i32_0 : i32, i32
  }
  func.func @transform_7(%arg0: i32) -> (i32, i32, i32) {
    %c0_i32 = arith.constant 0 : i32
    %c0_i32_0 = arith.constant 0 : i32
    %c0_i32_1 = arith.constant 0 : i32
    return %arg0, %c0_i32, %c0_i32_0 : i32, i32, i32
  }
}

</mosaic_0001>

<bundles_post_ra>
// kernel: tpu_custom_call.1
= control target key start
LH: loop header
LB: loop body
LE: loop exit
PB: predicated region body
PF: predicated region fallthrough
CT: control target
= control target key end

     0   :  { %s787_s24 = smov 0   ;;  %s839_s0 = inlined_call_operand.vmem [shape: f32[2,4,256], index: 0, kind: input, shape index: {}]   ;;  %s840_s1 = inlined_call_operand.vmem [shape: f32[8,36], index: 1, kind: input, shape index: {}]   ;;  %s841_s2 = inlined_call_operand.vmem [shape: f32[8,1], index: 2, kind: input, shape index: {}]   ;;  %s842_s3 = inlined_call_operand.vmem [shape: f32[8,1], index: 3, kind: input, shape index: {}]   ;;  %s843_s4 = inlined_call_operand.vmem [shape: f32[8,1], index: 4, kind: input, shape index: {}]   ;;  %s844_s5 = inlined_call_operand.vmem [shape: f32[16,8], index: 5, kind: input, shape index: {}]   ;;  %s845_s6 = inlined_call_operand.vmem [shape: f32[16,1], index: 6, kind: input, shape index: {}]   ;;  %s846_s7 = inlined_call_operand.vmem [shape: f32[2,16,1], index: 7, kind: output, shape index: {}]  }
   0x1 LB: > { %s678_s25 = sadd.s32 4294967295, %s734_s24   ;;  %p682_p0 = scmp.ge.s32.totalorder %s734_s24, 1  ;;  %s734_s24 = sphi %s787_s24, %s17_s24  }
   0x2   : > { %p237_p1 = scmp.lt.s32.totalorder %s734_s24, 3 }
   0x4   : > { %p238_p2 = pnand %p682_p0, %p237_p1 }
   0x5   : > { %p269_p3 = scmp.lt.s32.totalorder (!%p238_p2), %s678_s25, 1  ;;  %s736_s30 = smov (!%p238_p2), 113  }
   0x6   : > { %241 = sbr.rel (%p238_p2) target bundleno = 701 (0x2bd), region = 48  ;;  %s737_s8 = smov (!%p238_p2), 1  }
   0x7   : > { %s738_s9 = smov (!%p238_p2), 111   ;;  %s739_s10 = smov (!%p238_p2), 15  }
   0x8   : > { %s740_s11 = smov (!%p238_p2), 127   ;;  %s741_s12 = smov (!%p238_p2), 112  }
   0x9   : > { %s742_s13 = smov (!%p238_p2), 17   ;;  %s743_s14 = smov (!%p238_p2), 16  }
   0xb   : > { %v280_v0 = vlaneseq  ;;  %s848_s25 = smov (!%p269_p3, %s678_s25), 1  ;;  %v744_v24 = vmov 0.0   ;;  %vm374_vm4 = vcmask 1043576   ;;  %vm414_vm5 = vcmask 924672   ;;  %v458_v46 = vld [vmem:[%s841_s2] sm:$0xff] }
   0xc   : > { %s695_s26 = sshll.u32 %s848_s25, 3  ;;  %328 = vst [vmem:[#allocation2 + $0x10] sm:$0xff] %v744_v24  ;;  %vm419_vm6 = vcmask 920576   ;;  %vm429_vm7 = vcmask 916480   ;;  %vm434_vm8 = vcmask 916484   ;;  %vm440_vm9 = vcmask 908288  }
   0xd   : > { %v281_v1 = vand.u32 127, %v280_v0  ;;  %s273_s29 = scalar_lea.vmem %s839_s0, %s695_s26  ;;  %326 = vst [vmem:[#allocation2] sm:$0xff] %v744_v24  ;;  %vm383_vm10 = vcmask 7168   ;;  %vm445_vm11 = vcmask 904192   ;;  %vm387_vm12 = vcmask 1047564   ;;  %v447_v57 = vld [vmem:[%s840_s1] sm:$0xff] }
   0xe   : > { %v279_v3 = vld [vmem:[%s273_s29] sm:$0xff]  ;;  %327 = vst [vmem:[#allocation2 + $0x8] sm:$0xff] %v744_v24  ;;  %vm361_vm13 = vcmask 1047684   ;;  %vm370_vm14 = vcmask 121856   ;;  %vm408_vm15 = vcmask 1039364   ;;  %v745_v47 = vmov 0  }
   0xf   : > { %v282_v2 = vadd.s32 128, %v281_v1  ;;  %310 = vst [vmem:[#allocation1] ss:$2 sm:$0xff] %v279_v3  ;;  %v287_v4 = vand.u32 15, %v281_v1  ;;  %716 = vset.pattern.permute.xlu1 %v745_v47  ;;  %717 = vset.pattern.permute.xlu0 %v745_v47  ;;  %v562_v47 = vld [vmem:[%s845_s6] sm:$0xff] }
  0x10   : > { %329 = vst [vmem:[#allocation2 + $0x18] sm:$0xff] %v744_v24 }
  0x11   : > { %v294_v5 = vand.u32 15, %v282_v2  ;;  %vm307_vm0 = vcmp.lt.s32.totalorder %v287_v4, 15  ;;  %vm317_vm2 = vcmp.gt.s32.totalorder %v287_v4, 0  ;;  %330 = vst [vmem:[#allocation2 + $0x20] sm:$0xff] %v744_v24 }
  0x12   : > { %331 = vst [vmem:[#allocation2 + $0x28] sm:$0xff] %v744_v24 }
  0x13   : > { %vm308_vm1 = vcmp.lt.s32.totalorder %v294_v5, 15  ;;  %vm318_vm3 = vcmp.gt.s32.totalorder %v294_v5, 0  ;;  %332 = vst [vmem:[#allocation2 + $0x30] sm:$0xff] %v744_v24 }
  0x14   : > { %333 = vst [vmem:[#allocation2 + $0x38] sm:$0xff] %v744_v24 }
  0x15   : > { %334 = vst [vmem:[#allocation2 + $0x40] sm:$0xf] %v744_v24 }
  0x16   : > { %v311_v6 = vld.sshfl [vmem:[#allocation1] sm:$0xff pattern:$0x75316420]  ;;  %v312_v7 = vld.sshfl [vmem:[#allocation1 + $0x8] sm:$0xff pattern:$0x75316420] }
  0x17   : > { %v315_v8 = vsel %vm307_vm0, %v311_v6, 0.0  ;;  %319 = vst [vmem:[#allocation1] ss:$2 sm:$0xff] %v279_v3  ;;  %v316_v9 = vsel %vm308_vm1, %v312_v7, 0.0  ;;  %vm468_vm0 = vcmask 1043456   ;;  %vm403_vm1 = vcmask 1039360  }
  0x18   : > { %410 = vrot.lane.b32.xlu1 %v315_v8, %s736_s30  ;;  %v378_v10 = vrot.slane %v316_v9, 4  ;;  %v377_v14 = vrot.slane %v315_v8, 4  ;;  %335 = vst [vmem:[#allocation2 + $0x48] sm:$0xf] %v744_v24  ;;  %v746_v6 = vmov 8.0  }
  0x19   : > { %718 = vrcp.f32 %v746_v6 }
  0x1a   : > { %381 = vrot.lane.b32.xlu2 %v378_v10, %s737_s8 }
  0x1e   : > { %v320_v11 = vld.sshfl [vmem:[#allocation1] sm:$0xff pattern:$0x75316420]  ;;  %v321_v12 = vld.sshfl [vmem:[#allocation1 + $0x8] sm:$0xff pattern:$0x75316420] }
  0x1f   : > { %v324_v13 = vsel %vm317_vm2, %v320_v11, 0.0  ;;  %350 = vst [vmem:[#allocation1 + $0x1] ss:$2 sm:$0xff] %v279_v3  ;;  %v325_v15 = vsel %vm318_vm3, %v321_v12, 0.0  ;;  %vm346_vm2 = vcmask 1043592   ;;  %vm342_vm3 = vcmask 138240   ;;  %v719_v7 = vpop.eup %718 }
  0x20   : > { %436 = vrot.lane.b32.xlu0 %v324_v13, %s738_s9  ;;  %412 = vrot.lane.b32.xlu1 %v316_v9, %s736_s30  ;;  %v398_v18 = vrot.slane %v325_v15, 4  ;;  %v397_v21 = vrot.slane %v324_v13, 4 }
  0x22   : > { %366 = vrot.lane.b32.xlu2 %v324_v13, %s739_s10 }
  0x26   : > { %v351_v16 = vld.sshfl [vmem:[#allocation1] sm:$0xff pattern:$0x75316420]  ;;  %v352_v17 = vld.sshfl [vmem:[#allocation1 + $0x8] sm:$0xff pattern:$0x75316420] }
  0x27   : > { %390 = vst [vmem:[#allocation1] ss:$2 sm:$0xff] %v279_v3 }
  0x28   : > { %438 = vrot.lane.b32.xlu0 %v325_v15, %s738_s9  ;;  %379 = vrot.lane.b32.xlu1 %v377_v14, %s737_s8 }
  0x2e   : > { %v391_v19 = vld.sshfl [vmem:[#allocation1] sm:$0xff pattern:$0x75316420]  ;;  %v392_v20 = vld.sshfl [vmem:[#allocation1 + $0x8] sm:$0xff pattern:$0x75316420] }
  0x2f   : > { %422 = vst [vmem:[#allocation1 + $0x1] ss:$2 sm:$0xff] %v279_v3 }
  0x30   : > { %368 = vrot.lane.b32.xlu0 %v325_v15, %s739_s10  ;;  %401 = vrot.lane.b32.xlu1 %v398_v18, %s740_s11  ;;  %395 = vst [vmem:[#allocation2 + $0x20] sm:$0xf] %v391_v19  ;;  %s696_s10 = sshll.u32 %s848_s25, 4 }
  0x31   : > { %396 = vst [vmem:[#allocation2 + $0x28] sm:$0xf] %v392_v20 }
  0x36   : > { %v423_v22 = vld.sshfl [vmem:[#allocation1] sm:$0xff pattern:$0x75316420]  ;;  %v424_v23 = vld.sshfl [vmem:[#allocation1 + $0x8] sm:$0xff pattern:$0x75316420] }
  0x37   : > { %425 = vrot.lane.b32.xlu2 %v423_v22, %s741_s12 }
  0x38   : > { %399 = vrot.lane.b32.xlu0 %v397_v21, %s740_s11  ;;  %340 = vrot.lane.b32.xlu1 %v316_v9, %s742_s13 }
  0x3f   : > { %427 = vrot.lane.b32.xlu2 %v424_v23, %s741_s12 }
  0x40   : > { %338 = vrot.lane.b32.xlu0 %v315_v8, %s742_s13  ;;  %461 = vperm.xlu1 %716, %v458_v46   ;;  %v528_v8 = vmul.f32 8.0, %v719_v7  ;;  %s278_s13 = scalar_lea.vmem %s846_s7, %s696_s10 }
  0x42   : > { %v529_v9 = vsub.f32 1.0, %v528_v8 }
  0x44   : > { %v530_v13 = vmul.f32 %v719_v7, %v529_v9 }
  0x47   : > { %353 = vrot.lane.b32.xlu2 %v351_v16, %s743_s14  ;;  %v531_v16 = vadd.f32 %v719_v7, %v530_v13 }
  0x48   : > { %355 = vrot.lane.b32.xlu0 %v352_v17, %s743_s14 }
  0x74   : > { %v382_v25 = vpop.permute.xlu2 %381 }
  0x7c   : > { %v367_v26 = vpop.permute.xlu2 %366 }
  0x7d   : > { %375 = vst.msk [vmem:[#allocation2 + $0x10] sm:$0xf] %vm374_vm4, %v367_v26  ;;  %vm357_vm4 = vcmask 130048  }
  0x8a   : > { %v411_v27 = vpop.permute.xlu1 %410 }
  0x91   : > { %v426_v28 = vpop.permute.xlu2 %425 }
  0x92   : > { %v437_v29 = vpop.permute.xlu0 %436  ;;  %v413_v30 = vpop.permute.xlu1 %412 }
  0x93   : > { %v415_v31 = vsel %vm414_vm5, %v411_v27, %v413_v30  ;;  %420 = vst.msk [vmem:[#allocation2 + $0x38] sm:$0xf] %vm419_vm6, %v413_v30  ;;  %vm464_vm5 = vcmask 293888   ;;  %vm532_vm6 = vweird.f32 %v719_v7 }
  0x94   : > { %418 = vst [vmem:[#allocation2 + $0x30] sm:$0xf] %v415_v31  ;;  %v533_v19 = vsel %vm532_vm6, %v719_v7, %v531_v16 }
  0x99   : > { %v428_v32 = vpop.permute.xlu2 %427 }
  0x9a   : > { %v430_v33 = vsel %vm429_vm7, %v426_v28, %v428_v32  ;;  %435 = vst.msk [vmem:[#allocation2 + $0x38] sm:$0xf0] %vm434_vm8, %v428_v32  ;;  %v439_v34 = vpop.permute.xlu0 %438  ;;  %v380_v35 = vpop.permute.xlu1 %379 }
  0x9b   : > { %433 = vst [vmem:[#allocation2 + $0x30] sm:$0xf0] %v430_v33  ;;  %v441_v36 = vsel %vm440_vm9, %v437_v29, %v439_v34  ;;  %v384_v37 = vsel %vm383_vm10, %v380_v35, %v382_v25 }
  0x9c   : > { %444 = vst [vmem:[#allocation2 + $0x40] sm:$0xf] %v441_v36 }
  0x9d   : > { %446 = vst.msk [vmem:[#allocation2 + $0x48] sm:$0xf] %vm445_vm11, %v439_v34  ;;  %vm564_vm11 = vcmask 64512  }
  0x9e   : > { %388 = vst.msk [vmem:[#allocation2 + $0x10] sm:$0xf0] %vm387_vm12, %v380_v35 }
  0x9f   : > { %389 = vst [vmem:[#allocation2 + $0x18] sm:$0xf0] %v384_v37 }
  0xa1   : > { %v354_v38 = vpop.permute.xlu2 %353  ;;  %v455_v44 = vld [vmem:[#allocation2 + $0x38] sm:$0xff] }
  0xa2   : > { %v369_v39 = vpop.permute.xlu0 %368  ;;  %v402_v40 = vpop.permute.xlu1 %401  ;;  %362 = vst.msk [vmem:[#allocation2] sm:$0xf0] %vm361_vm13, %v354_v38  ;;  %v454_v45 = vld [vmem:[#allocation2 + $0x30] sm:$0xff] }
  0xa3   : > { %v371_v41 = vsel %vm370_vm14, %v367_v26, %v369_v39  ;;  %409 = vst.msk [vmem:[#allocation2 + $0x28] sm:$0xf0] %vm408_vm15, %v402_v40  ;;  %v456_v42 = vld [vmem:[#allocation2 + $0x40] sm:$0xf]  ;;  %v556_v39 = vld [vmem:[%s842_s3] sm:$0xff] }
  0xa4   : > { %376 = vst [vmem:[#allocation2 + $0x18] sm:$0xf] %v371_v41  ;;  %v457_v43 = vld [vmem:[#allocation2 + $0x48] sm:$0xf]  ;;  %687 = vmatpush.msk.msra.mxu0 %vm468_vm0, %v456_v42  ;;  %v558_v41 = vld [vmem:[%s843_s4] sm:$0xff] }
  0xa5   : > { %689 = vmatpush.msk.msra.mxu1 %vm468_vm0, %v457_v43  ;;  %v450_v56 = vld [vmem:[#allocation2 + $0x10] sm:$0xff] }
  0xa6   : > { %487 = vmatpush.msra.mxu0 %v454_v45  ;;  %v561_v45 = vld [vmem:[%s844_s5 + $0x8] sm:$0xff] }
  0xa7   : > { %507 = vmatpush.msra.mxu1 %v455_v44  ;;  %v560_v44 = vld [vmem:[%s844_s5] sm:$0xff] }
  0xaa   : > { %v400_v48 = vpop.permute.xlu0 %399  ;;  %v453_v49 = vld [vmem:[#allocation2 + $0x28] sm:$0xff]  ;;  %v341_v52 = vpop.permute.xlu1 %340 }
  0xab   : > { %v404_v50 = vsel %vm403_vm1, %v400_v48, %v402_v40  ;;  %508 = vmatpush.msra.mxu1 %v453_v49  ;;  %v451_v51 = vld [vmem:[#allocation2 + $0x18] sm:$0xff]  ;;  %v563_v48 = vld [vmem:[%s845_s6 + $0x8] sm:$0xff] }
  0xac   : > { %407 = vst [vmem:[#allocation2 + $0x20] sm:$0xf0] %v404_v50 }
  0xad   : > { %509 = vmatpush.msra.mxu1 %v451_v51 }
  0xb2   : > { %v339_v53 = vpop.permute.xlu0 %338  ;;  %v462_v63 = vpop.permute.xlu1 %461 }
  0xb3   : > { %347 = vst.msk [vmem:[#allocation2] sm:$0xf] %vm346_vm2, %v339_v53  ;;  %v343_v54 = vsel %vm342_vm3, %v339_v53, %v341_v52  ;;  %v452_v55 = vld [vmem:[#allocation2 + $0x20] sm:$0xff] }
  0xb4   : > { %348 = vst [vmem:[#allocation2 + $0x8] sm:$0xf] %v343_v54  ;;  %488 = vmatpush.msra.mxu0 %v452_v55 }
  0xb6   : > { %489 = vmatpush.msra.mxu0 %v450_v56 }
  0xba   : > { %v356_v58 = vpop.permute.xlu0 %355  ;;  %v448_v59 = vld [vmem:[#allocation2] sm:$0xff] }
  0xbb   : > { %v358_v60 = vsel %vm357_vm4, %v354_v38, %v356_v58  ;;  %490 = vmatpush.msra.mxu0 %v448_v59 }
  0xbc   : > { %363 = vst [vmem:[#allocation2 + $0x8] sm:$0xf0] %v358_v60  ;;  %688 = vmatmul.msk.f32.vlgmr.msra.gmra.mxu0 %vm464_vm5, %v447_v57 }
  0xc3   : > { %v449_v61 = vld [vmem:[#allocation2 + $0x8] sm:$0xff] }
  0xc4   : > { %510 = vmatpush.msra.mxu1 %v449_v61 }
  0xc5   : > { %690 = vmatmul.msk.f32.vlgmr.msra.gmra.mxu1 %vm464_vm5, %v447_v57 }
 0x139   : > { %v492_v62 = vpop.f32.mrf.mxu0 }
 0x13a   : > { %v493_v0 = vadd.f32 %v492_v62, %v462_v63 }
 0x13c   : > { %v515_v3 = vmax.f32 %v493_v0, 0.0 }
 0x142   : > { %v512_v1 = vpop.f32.mrf.mxu1 }
 0x143   : > { %v513_v2 = vadd.f32 %v512_v1, %v462_v63 }
 0x145   : > { %v516_v4 = vmax.f32 %v513_v2, 0.0 }
 0x147   : > { %v517_v5 = vadd.f32 %v516_v4, %v515_v3 }
 0x149   : > { %518 = vadd.xlane.f32.xlu2 %v517_v5 }
 0x1bc   : > { %v519_v10 = vpop.xlane.xlu2 %518 }
 0x1bd   : > { %v520_v11 = vmul.f32 0.00390625, %v519_v10 }
 0x1bf   : > { %v521_v12 = vrot.slane %v520_v11, 4 }
 0x1c1   : > { %v522_v14 = vadd.f32 %v521_v12, %v520_v11 }
 0x1c3   : > { %v523_v15 = vrot.slane %v522_v14, 2 }
 0x1c5   : > { %v524_v17 = vadd.f32 %v523_v15, %v522_v14 }
 0x1c7   : > { %v525_v18 = vrot.slane %v524_v17, 1 }
 0x1c9   : > { %v526_v20 = vadd.f32 %v525_v18, %v524_v17 }
 0x1cb   : > { %v534_v21 = vmul.f32 %v533_v19, %v526_v20 }
 0x1cd   : > { %v535_v22 = vsub.f32 %v520_v11, %v534_v21 }
 0x1cf   : > { %v536_v23 = vmul.f32 %v535_v22, %v535_v22 }
 0x1d1   : > { %v537_v24 = vrot.slane %v536_v23, 4 }
 0x1d3   : > { %v538_v25 = vadd.f32 %v537_v24, %v536_v23 }
 0x1d5   : > { %v539_v26 = vrot.slane %v538_v25, 2 }
 0x1d7   : > { %v540_v27 = vadd.f32 %v539_v26, %v538_v25 }
 0x1d9   : > { %v541_v28 = vrot.slane %v540_v27, 1 }
 0x1db   : > { %v542_v29 = vadd.f32 %v541_v28, %v540_v27 }
 0x1dd   : > { %v543_v30 = vmul.f32 %v542_v29, %v533_v19 }
 0x1df   : > { %v544_v31 = vadd.f32 1e-06, %v543_v30 }
 0x1e1   : > { %720 = vrsqrt.f32 %v544_v31  ;;  %vm551_vm8 = vweird.f32 %v544_v31 }
 0x1e7   : > { %v721_v32 = vpop.eup %720 }
 0x1e8   : > { %v546_v33 = vmul.f32 %v721_v32, %v544_v31  ;;  %vm552_vm7 = vweird.f32 %v721_v32 }
 0x1e9   : > { %vm553_vm9 = vmor %vm551_vm8, %vm552_vm7 }
 0x1ea   : > { %v547_v34 = vmul.f32 %v721_v32, %v546_v33 }
 0x1ec   : > { %v548_v35 = vmul.f32 0.5, %v547_v34 }
 0x1ee   : > { %v549_v36 = vsub.f32 1.5, %v548_v35 }
 0x1f0   : > { %v550_v37 = vmul.f32 %v721_v32, %v549_v36 }
 0x1f2   : > { %v554_v38 = vsel %vm553_vm9, %v721_v32, %v550_v37 }
 0x1f3   : > { %v555_v40 = vmul.f32 %v554_v38, %v535_v22 }
 0x1f5   : > { %v557_v42 = vmul.f32 %v556_v39, %v555_v40 }
 0x1f7   : > { %v559_v43 = vadd.f32 %v558_v41, %v557_v42 }
 0x1f9   : > { %586 = vmatpush.msra.mxu2 %v559_v43 }
 0x1fa   : > { %691 = vmatmul.msk.f32.vlgmr.msra.gmra.mxu2 %vm564_vm11, %v560_v44 }
 0x202   : > { %692 = vmatmul.msk.f32.gmra.mxu2 %vm564_vm11, %v561_v45 }
 0x27d   : > { %v588_v46 = vpop.f32.mrf.mxu2 }
 0x27e   : > { %v589_v49 = vadd.f32 %v588_v46, %v562_v47 }
 0x280   : > { %v594_v52 = vsel %vm383_vm10, %v589_v49, -inf }
 0x285   : > { %v591_v50 = vpop.f32.mrf.mxu2 }
 0x286   : > { %v592_v51 = vadd.f32 %v591_v50, %v563_v48 }
 0x288   : > { %v595_v53 = vsel %vm383_vm10, %v592_v51, -inf }
 0x289   : > { %v596_v54 = vmax.f32 %v594_v52, %v595_v53 }
 0x28b   : > { %v597_v55 = vrot.slane %v596_v54, 4 }
 0x28d   : > { %v598_v56 = vmax.f32 %v596_v54, %v597_v55 }
 0x28f   : > { %v599_v57 = vrot.slane %v598_v56, 2 }
 0x291   : > { %v600_v58 = vmax.f32 %v598_v56, %v599_v57 }
 0x293   : > { %v601_v59 = vrot.slane %v600_v58, 1 }
 0x295   : > { %v602_v60 = vmax.f32 %v600_v58, %v601_v59 }
 0x297   : > { %v603_v61 = vsub.f32 %v589_v49, %v602_v60  ;;  %v604_v62 = vsub.f32 %v592_v51, %v602_v60 }
 0x299   : > { %v605_v63 = vmul.f32 1.442695, %v603_v61  ;;  %v607_v0 = vmul.f32 1.442695, %v604_v62 }
 0x29b   : > { %722 = vpow2.f32 %v605_v63 }
 0x29c   : > { %724 = vpow2.f32 %v607_v0 }
 0x2a1   : > { %v723_v1 = vpop.eup %722 }
 0x2a2   : > { %v725_v2 = vpop.eup %724  ;;  %v609_v3 = vsel %vm383_vm10, %v723_v1, 0.0 }
 0x2a3   : > { %v610_v4 = vsel %vm383_vm10, %v725_v2, 0.0 }
 0x2a4   : > { %v611_v5 = vadd.f32 %v610_v4, %v609_v3 }
 0x2a6   : > { %v612_v6 = vrot.slane %v611_v5, 4 }
 0x2a8   : > { %v613_v7 = vadd.f32 %v612_v6, %v611_v5 }
 0x2aa   : > { %v614_v8 = vrot.slane %v613_v7, 2 }
 0x2ac   : > { %v615_v9 = vadd.f32 %v614_v8, %v613_v7 }
 0x2ae   : > { %v616_v10 = vrot.slane %v615_v9, 1 }
 0x2b0   : > { %v617_v11 = vadd.f32 %v616_v10, %v615_v9 }
 0x2b2   : > { %726 = vrcp.f32 %v617_v11 }
 0x2b8   : > { %v727_v12 = vpop.eup %726 }
 0x2b9   : > { %v619_v13 = vmul.f32 %v727_v12, %v723_v1  ;;  %v620_v14 = vmul.f32 %v727_v12, %v725_v2 }
 0x2bb   : > { %621 = vst.msk [vmem:[%s278_s13] sm:$0xff] %vm383_vm10, %v619_v13 }
 0x2bc   : > { %622 = vst.msk [vmem:[%s278_s13 + $0x8] sm:$0xff] %vm383_vm10, %v620_v14 }
 0x2bd PF: > { %s17_s24 = sadd.s32 1, %s734_s24  }
 0x2be   : > { %p14_p4 = scmp.ge.s32.totalorder %s17_s24, 4  }
 0x2c0   :  { %16 = sbr.rel (!%p14_p4) target bundleno = 1 (0x1), region = 80 }

</bundles_post_ra>
